<compile_context>
chip_gen: v7x
topology: tpu7x:2x2x1
jax: 0.10.0
libtpu: 0.0.40
codegen_flags: <defaults>
</compile_context>

<pallas_src>
import functools

import jax
import jax.numpy as jnp
from jax.experimental import pallas as pl
from jax.experimental.pallas import tpu as pltpu

_LANE = 128


def _round_up(n, m):
    return ((n + m - 1) // m) * m


@functools.lru_cache(maxsize=1)
def _num_tensorcores():
    """Best-effort TensorCore-per-chip count (1 on v5e/v6e, 2 on v7x)."""
    try:
        info = pltpu.get_tpu_info()
    except Exception:
        return 1
    for name in ("num_cores", "core_count", "num_tensorcores",
                 "tensorcore_count", "cores_per_chip", "num_cores_per_chip"):
        v = getattr(info, name, None)
        if isinstance(v, int) and v > 0:
            return v
    # TODO(synk): no stable core-count field found on TpuInfo; default to 1
    # (correct everywhere, just skips the multi-TC grid split on v7x).
    return 1


def _discriminator_kernel(x_ref, w1_ref, b1_ref, w2_ref, b2_ref, w3_ref,
                          b3_ref, out_ref):
    """3-layer MLP + sigmoid on one (tile_b, input_dim) batch tile, all in VMEM."""
    x = x_ref[...]  # keep input dtype: bf16 feeds the MXU natively, f32 works too

    # Layers 1 & 2: MXU matmuls with f32 accumulation; bias add + tanh on VPU/EUP.
    h1 = jnp.tanh(
        jnp.dot(x, w1_ref[...], preferred_element_type=jnp.float32)
        + b1_ref[...])
    h2 = jnp.tanh(
        jnp.dot(h1, w2_ref[...], preferred_element_type=jnp.float32)
        + b2_ref[...])

    # Layer 3 (hidden -> 1): an N=1 MXU matmul would occupy the MXU / result
    # FIFO for a single useful column, so use a VPU multiply + XLU lane
    # reduction instead (those slots are otherwise idle here).
    logits = jnp.sum(h2 * w3_ref[...], axis=-1, keepdims=True) + b3_ref[0]
    probs = jax.nn.sigmoid(logits)                       # (tile, 1)

    # Lane-dense store: relayout (tile, 1) -> (1, tile) on the (idle) XLU so
    # the output writeback is a single unmasked, contiguous row instead of
    # ~tile/8 masked partial stores + a strided per-row DMA.
    out_ref[...] = jnp.transpose(probs, (1, 0)).astype(out_ref.dtype)


@functools.partial(jax.jit,
                   static_argnames=("tile_b", "single_buffer_weights"))
def discriminator_forward(x, params, *, tile_b=1024, single_buffer_weights=True):
    """Runs the discriminator MLP with a Pallas kernel tiled over the batch.

    Mixed-precision contract: pass bf16 x/params from the producer if you want
    bf16 HBM traffic / MXU rate; the kernel always accumulates in f32.  No
    casts are performed here (a wrapper-side cast would just be an extra XLA
    HBM pass).
    """
    w1, b1, w2, b2, w3, b3 = params
    batch, input_dim = x.shape
    hidden = w1.shape[1]

    # --- batch tiling ---------------------------------------------------
    # Tiles are multiples of 128 rows (sublane/lane aligned, lane-dense output
    # blocks).  Single-TC chips (v5e/v6e) run one big tile -- per-step overhead
    # (~0.35 us) is the dominant cost for this tiny MLP.  Multi-TC chips (v7x)
    # get >=2 grid steps per core (so BlockSpec pipelining hides the per-tile
    # x DMA) as long as each tile keeps >=256 rows.
    batch_pad = _round_up(batch, _LANE)
    tile_cap = max(_round_up(tile_b, _LANE), _LANE)
    n_tiles = pl.cdiv(batch_pad, tile_cap)
    n_cores = _num_tensorcores()
    if n_cores > 1:
        for want in (2 * n_cores, n_cores):
            if n_tiles < want and batch_pad // want >= 256:
                n_tiles = want
                break
    tile = _round_up(pl.cdiv(batch_pad, n_tiles), _LANE)
    n_tiles = pl.cdiv(batch_pad, tile)
    padded = tile * n_tiles
    if padded != batch:
        x = jnp.pad(x, ((0, padded - batch), (0, 0)))

    w3_row = w3.reshape(1, hidden)  # (hidden, 1) -> row for the VPU reduction
    b3_s = b3.reshape(1)            # scalar bias lives in SMEM

    # --- cost estimate (advisory; per-operand dtype) ----------------------
    def _nbytes(a):
        return a.size * jnp.dtype(a.dtype).itemsize

    x_item = jnp.dtype(x.dtype).itemsize
    cost = pl.CostEstimate(
        flops=2 * padded * (input_dim * hidden + hidden * hidden + hidden),
        transcendentals=padded * (2 * hidden + 1),
        bytes_accessed=(padded * input_dim * x_item      # x in
                        + _nbytes(w1) + _nbytes(b1) + _nbytes(w2)
                        + _nbytes(b2) + _nbytes(w3) + _nbytes(b3)
                        + padded * x_item),              # lane-dense out
    )

    # Grid-invariant operands: constant index_map -> single-buffer them so the
    # resident weights don't get a useless second VMEM copy.
    if single_buffer_weights:
        def wspec(shape):
            return pl.BlockSpec(shape, lambda i: (0, 0),
                                pipeline_mode=pl.Buffered(1))
    else:
        def wspec(shape):
            return pl.BlockSpec(shape, lambda i: (0, 0))

    # TODO(synk): if this wrapper is ever used with large input_dim/hidden,
    # add a K-tiled "arbitrary" reduction axis for w1/w2 (and/or set
    # vmem_limit_bytes) instead of keeping both weights fully VMEM-resident;
    # at hidden=32 they are a few KiB and residency is the right call.
    out = pl.pallas_call(
        _discriminator_kernel,
        out_shape=jax.ShapeDtypeStruct((1, padded), x.dtype),
        grid_spec=pltpu.PrefetchScalarGridSpec(
            num_scalar_prefetch=0,
            grid=(n_tiles,),
            in_specs=[
                pl.BlockSpec((tile, input_dim), lambda i: (i, 0)),  # x tile
                wspec((input_dim, hidden)),                         # w1 (resident)
                wspec((1, hidden)),                                 # b1
                wspec((hidden, hidden)),                            # w2
                wspec((1, hidden)),                                 # b2
                wspec((1, hidden)),                                 # w3 (row)
                pl.BlockSpec(memory_space=pltpu.MemorySpace.SMEM),  # b3 scalar
            ],
            # Lane-dense output: each grid step writes a (1, tile) row slab.
            out_specs=pl.BlockSpec((1, tile), lambda i: (0, i)),
        ),
        compiler_params=pltpu.CompilerParams(
            dimension_semantics=("parallel",)),
        cost_estimate=cost,
    )(x, w1, b1, w2, b2, w3_row, b3_s)

    # (1, padded) is contiguous; reshape to (padded, 1) is metadata-only.
    return out.reshape(padded, 1)[:batch]


def init_params(key, input_dim, hidden_dim, dtype=jnp.float32):
    """Deterministic init matching PyTorch Linear default U(-1/sqrt(fan_in), +)."""
    k1, k2, k3, k4, k5, k6 = jax.random.split(key, 6)

    def uniform(k, shape, fan_in):
        bound = 1.0 / jnp.sqrt(jnp.float32(fan_in))
        return jax.random.uniform(k, shape, jnp.float32, -bound, bound).astype(dtype)

    # Stored as (fan_in, fan_out) so the kernel does x @ W.
    w1 = uniform(k1, (input_dim, hidden_dim), input_dim)
    b1 = uniform(k2, (1, hidden_dim), input_dim)
    w2 = uniform(k3, (hidden_dim, hidden_dim), hidden_dim)
    b2 = uniform(k4, (1, hidden_dim), hidden_dim)
    w3 = uniform(k5, (hidden_dim, 1), hidden_dim)
    b3 = uniform(k6, (1, 1), hidden_dim)
    return (w1, b1, w2, b2, w3, b3)


def reference_forward(x, params):
    """Pure-JAX reference of the PyTorch forward pass."""
    w1, b1, w2, b2, w3, b3 = params
    h1 = jnp.tanh(x @ w1 + b1)
    h2 = jnp.tanh(h1 @ w2 + b2)
    return jax.nn.sigmoid(h2 @ w3 + b3)


def _run(x, params):
    """Run the Pallas forward; fall back to double-buffered weights if the
    installed jax rejects pl.Buffered(1) (pure-VMEM optimization, same math)."""
    try:
        return jax.block_until_ready(discriminator_forward(x, params))
    except Exception:
        return jax.block_until_ready(
            discriminator_forward(x, params, single_buffer_weights=False))


if __name__ == "__main__":
    input_dim = 32
    hidden_dim = 32

    key = jax.random.PRNGKey(0)
    kx1, kx2, kp = jax.random.split(key, 3)
    params = init_params(kp, input_dim, hidden_dim)

    # Small case (single tile, row padding only).
    batch = 16
    x_small = jax.random.normal(kx1, (batch, input_dim), dtype=jnp.float32)
    out_small = _run(x_small, params)
    ref_small = reference_forward(x_small, params)
    assert out_small.shape == (batch, 1), out_small.shape
    assert jnp.allclose(out_small, ref_small, atol=1e-5, rtol=1e-5), (
        f"max abs err {jnp.max(jnp.abs(out_small - ref_small))}")

    # Larger, non-multiple batch: exercises padding + (on multi-TC chips) the
    # multi-step parallel grid.
    batch_big = 1000
    x_big = jax.random.normal(kx2, (batch_big, input_dim), dtype=jnp.float32)
    out_big = _run(x_big, params)
    ref_big = reference_forward(x_big, params)
    assert out_big.shape == (batch_big, 1), out_big.shape
    assert jnp.allclose(out_big, ref_big, atol=1e-5, rtol=1e-5), (
        f"max abs err {jnp.max(jnp.abs(out_big - ref_big))}")

    print("KERNEL_OK")
</pallas_src>

<mosaic_0001>
module attributes {stable_mosaic.version = 11 : i64} {
  func.func @_discriminator_kernel(%arg0: i32, %arg1: memref<128x32xf32, #tpu.memory_space<vmem>>, %arg2: memref<32x32xf32, #tpu.memory_space<vmem>>, %arg3: memref<1x32xf32, #tpu.memory_space<vmem>>, %arg4: memref<32x32xf32, #tpu.memory_space<vmem>>, %arg5: memref<1x32xf32, #tpu.memory_space<vmem>>, %arg6: memref<1x32xf32, #tpu.memory_space<vmem>>, %arg7: memref<1xf32, #tpu.memory_space<smem>>, %arg8: memref<1x128xf32, #tpu.memory_space<vmem>>) attributes {dimension_semantics = [#tpu.dimension_semantics<parallel>], iteration_bounds = array<i64: 1>, scalar_prefetch = 0 : i64, scratch_operands = 0 : i64, tpu.core_type = #tpu.core_type<tc>, window_params = [{transform_indices = @transform_0, window_bounds = array<i64: 128, 32>}, {pipeline_mode = #tpu.pipeline_mode<synchronous>, transform_indices = @transform_1, window_bounds = array<i64: 32, 32>}, {pipeline_mode = #tpu.pipeline_mode<synchronous>, transform_indices = @transform_2, window_bounds = array<i64: 1, 32>}, {pipeline_mode = #tpu.pipeline_mode<synchronous>, transform_indices = @transform_3, window_bounds = array<i64: 32, 32>}, {pipeline_mode = #tpu.pipeline_mode<synchronous>, transform_indices = @transform_4, window_bounds = array<i64: 1, 32>}, {pipeline_mode = #tpu.pipeline_mode<synchronous>, transform_indices = @transform_5, window_bounds = array<i64: 1, 32>}, {transform_indices = @transform_6, window_bounds = array<i64: 1>}, {transform_indices = @transform_7, window_bounds = array<i64: 1, 128>}]} {
    %c0 = arith.constant 0 : index
    %c0_0 = arith.constant 0 : index
    %0 = vector.load %arg1[%c0, %c0_0] : memref<128x32xf32, #tpu.memory_space<vmem>>, vector<128x32xf32>
    %c0_1 = arith.constant 0 : index
    %c0_2 = arith.constant 0 : index
    %1 = vector.load %arg2[%c0_1, %c0_2] : memref<32x32xf32, #tpu.memory_space<vmem>>, vector<32x32xf32>
    %cst = arith.constant dense<0.000000e+00> : vector<128x32xf32>
    %2 = tpu.matmul %0, %1, %cst {dimension_numbers = #tpu.dot_dimension_numbers<[1], [0], [0], [1], [0, 0, 1, 1], [], []>} : vector<128x32xf32>, vector<32x32xf32>, vector<128x32xf32> -> vector<128x32xf32>
    %c0_3 = arith.constant 0 : index
    %c0_4 = arith.constant 0 : index
    %3 = vector.load %arg3[%c0_3, %c0_4] : memref<1x32xf32, #tpu.memory_space<vmem>>, vector<1x32xf32>
    %4 = vector.broadcast %3 : vector<1x32xf32> to vector<128x32xf32>
    %5 = arith.addf %2, %4 : vector<128x32xf32>
    %6 = math.tanh %5 : vector<128x32xf32>
    %c0_5 = arith.constant 0 : index
    %c0_6 = arith.constant 0 : index
    %7 = vector.load %arg4[%c0_5, %c0_6] : memref<32x32xf32, #tpu.memory_space<vmem>>, vector<32x32xf32>
    %cst_7 = arith.constant dense<0.000000e+00> : vector<128x32xf32>
    %8 = tpu.matmul %6, %7, %cst_7 {dimension_numbers = #tpu.dot_dimension_numbers<[1], [0], [0], [1], [0, 0, 1, 1], [], []>} : vector<128x32xf32>, vector<32x32xf32>, vector<128x32xf32> -> vector<128x32xf32>
    %c0_8 = arith.constant 0 : index
    %c0_9 = arith.constant 0 : index
    %9 = vector.load %arg5[%c0_8, %c0_9] : memref<1x32xf32, #tpu.memory_space<vmem>>, vector<1x32xf32>
    %10 = vector.broadcast %9 : vector<1x32xf32> to vector<128x32xf32>
    %11 = arith.addf %8, %10 : vector<128x32xf32>
    %12 = math.tanh %11 : vector<128x32xf32>
    %c0_10 = arith.constant 0 : index
    %c0_11 = arith.constant 0 : index
    %13 = vector.load %arg6[%c0_10, %c0_11] : memref<1x32xf32, #tpu.memory_space<vmem>>, vector<1x32xf32>
    %14 = vector.broadcast %13 : vector<1x32xf32> to vector<128x32xf32>
    %15 = arith.mulf %12, %14 : vector<128x32xf32>
    %cst_12 = arith.constant dense<0.000000e+00> : vector<128xf32>
    %16 = vector.multi_reduction <add>, %15, %cst_12 [1] : vector<128x32xf32> to vector<128xf32>
    %17 = vector.shape_cast %16 : vector<128xf32> to vector<128x1xf32>
    %c0_13 = arith.constant 0 : index
    %18 = memref.load %arg7[%c0_13] : memref<1xf32, #tpu.memory_space<smem>>
    %19 = vector.broadcast %18 : f32 to vector<128x1xf32>
    %20 = arith.addf %17, %19 : vector<128x1xf32>
    %21 = arith.negf %20 : vector<128x1xf32>
    %22 = math.exp %21 : vector<128x1xf32>
    %cst_14 = arith.constant 1.000000e+00 : f32
    %23 = vector.broadcast %cst_14 : f32 to vector<128x1xf32>
    %24 = arith.addf %23, %22 : vector<128x1xf32>
    %25 = arith.divf %23, %24 : vector<128x1xf32>
    %26 = tpu.transpose %25, [1, 0] : vector<128x1xf32> -> vector<1x128xf32>
    %c0_15 = arith.constant 0 : index
    %c0_16 = arith.constant 0 : index
    %27 = vector.load %arg8[%c0_15, %c0_16] : memref<1x128xf32, #tpu.memory_space<vmem>>, vector<1x128xf32>
    tpu.vector_store %arg8[%c0_15, %c0_16], %26 {strides = array<i32>} : memref<1x128xf32, #tpu.memory_space<vmem>>, vector<1x128xf32>,
    return
  }
  func.func @transform_0(%arg0: i32) -> (i32, i32) {
    %c0_i32 = arith.constant 0 : i32
    %c0_i32_0 = arith.constant 0 : i32
    return %arg0, %c0_i32 : i32, i32
  }
  func.func @transform_1(%arg0: i32) -> (i32, i32) {
    %c0_i32 = arith.constant 0 : i32
    %c0_i32_0 = arith.constant 0 : i32
    %c0_i32_1 = arith.constant 0 : i32
    return %c0_i32, %c0_i32_0 : i32, i32
  }
  func.func @transform_2(%arg0: i32) -> (i32, i32) {
    %c0_i32 = arith.constant 0 : i32
    %c0_i32_0 = arith.constant 0 : i32
    %c0_i32_1 = arith.constant 0 : i32
    return %c0_i32, %c0_i32_0 : i32, i32
  }
  func.func @transform_3(%arg0: i32) -> (i32, i32) {
    %c0_i32 = arith.constant 0 : i32
    %c0_i32_0 = arith.constant 0 : i32
    %c0_i32_1 = arith.constant 0 : i32
    return %c0_i32, %c0_i32_0 : i32, i32
  }
  func.func @transform_4(%arg0: i32) -> (i32, i32) {
    %c0_i32 = arith.constant 0 : i32
    %c0_i32_0 = arith.constant 0 : i32
    %c0_i32_1 = arith.constant 0 : i32
    return %c0_i32, %c0_i32_0 : i32, i32
  }
  func.func @transform_5(%arg0: i32) -> (i32, i32) {
    %c0_i32 = arith.constant 0 : i32
    %c0_i32_0 = arith.constant 0 : i32
    %c0_i32_1 = arith.constant 0 : i32
    return %c0_i32, %c0_i32_0 : i32, i32
  }
  func.func @transform_6(%arg0: i32) -> i32 {
    %c0_i32 = arith.constant 0 : i32
    %c0_i32_0 = arith.constant 0 : i32
    return %c0_i32 : i32
  }
  func.func @transform_7(%arg0: i32) -> (i32, i32) {
    %c0_i32 = arith.constant 0 : i32
    %c0_i32_0 = arith.constant 0 : i32
    return %c0_i32, %arg0 : i32, i32
  }
}

module attributes {stable_mosaic.version = 11 : i64} {
  func.func @_discriminator_kernel(%arg0: i32, %arg1: memref<128x32xf32, #tpu.memory_space<vmem>>, %arg2: memref<32x32xf32, #tpu.memory_space<vmem>>, %arg3: memref<1x32xf32, #tpu.memory_space<vmem>>, %arg4: memref<32x32xf32, #tpu.memory_space<vmem>>, %arg5: memref<1x32xf32, #tpu.memory_space<vmem>>, %arg6: memref<1x32xf32, #tpu.memory_space<vmem>>, %arg7: memref<1xf32, #tpu.memory_space<smem>>, %arg8: memref<1x128xf32, #tpu.memory_space<vmem>>) attributes {dimension_semantics = [#tpu.dimension_semantics<parallel>], iteration_bounds = array<i64: 1>, scalar_prefetch = 0 : i64, scratch_operands = 0 : i64, tpu.core_type = #tpu.core_type<tc>, window_params = [{transform_indices = @transform_0, window_bounds = array<i64: 128, 32>}, {pipeline_mode = #tpu.pipeline_mode<synchronous>, transform_indices = @transform_1, window_bounds = array<i64: 32, 32>}, {pipeline_mode = #tpu.pipeline_mode<synchronous>, transform_indices = @transform_2, window_bounds = array<i64: 1, 32>}, {pipeline_mode = #tpu.pipeline_mode<synchronous>, transform_indices = @transform_3, window_bounds = array<i64: 32, 32>}, {pipeline_mode = #tpu.pipeline_mode<synchronous>, transform_indices = @transform_4, window_bounds = array<i64: 1, 32>}, {pipeline_mode = #tpu.pipeline_mode<synchronous>, transform_indices = @transform_5, window_bounds = array<i64: 1, 32>}, {transform_indices = @transform_6, window_bounds = array<i64: 1>}, {transform_indices = @transform_7, window_bounds = array<i64: 1, 128>}]} {
    %c0 = arith.constant 0 : index
    %c0_0 = arith.constant 0 : index
    %0 = vector.load %arg1[%c0, %c0_0] : memref<128x32xf32, #tpu.memory_space<vmem>>, vector<128x32xf32>
    %c0_1 = arith.constant 0 : index
    %c0_2 = arith.constant 0 : index
    %1 = vector.load %arg2[%c0_1, %c0_2] : memref<32x32xf32, #tpu.memory_space<vmem>>, vector<32x32xf32>
    %cst = arith.constant dense<0.000000e+00> : vector<128x32xf32>
    %2 = tpu.matmul %0, %1, %cst {dimension_numbers = #tpu.dot_dimension_numbers<[1], [0], [0], [1], [0, 0, 1, 1], [], []>} : vector<128x32xf32>, vector<32x32xf32>, vector<128x32xf32> -> vector<128x32xf32>
    %c0_3 = arith.constant 0 : index
    %c0_4 = arith.constant 0 : index
    %3 = vector.load %arg3[%c0_3, %c0_4] : memref<1x32xf32, #tpu.memory_space<vmem>>, vector<1x32xf32>
    %4 = vector.broadcast %3 : vector<1x32xf32> to vector<128x32xf32>
    %5 = arith.addf %2, %4 : vector<128x32xf32>
    %6 = math.tanh %5 : vector<128x32xf32>
    %c0_5 = arith.constant 0 : index
    %c0_6 = arith.constant 0 : index
    %7 = vector.load %arg4[%c0_5, %c0_6] : memref<32x32xf32, #tpu.memory_space<vmem>>, vector<32x32xf32>
    %cst_7 = arith.constant dense<0.000000e+00> : vector<128x32xf32>
    %8 = tpu.matmul %6, %7, %cst_7 {dimension_numbers = #tpu.dot_dimension_numbers<[1], [0], [0], [1], [0, 0, 1, 1], [], []>} : vector<128x32xf32>, vector<32x32xf32>, vector<128x32xf32> -> vector<128x32xf32>
    %c0_8 = arith.constant 0 : index
    %c0_9 = arith.constant 0 : index
    %9 = vector.load %arg5[%c0_8, %c0_9] : memref<1x32xf32, #tpu.memory_space<vmem>>, vector<1x32xf32>
    %10 = vector.broadcast %9 : vector<1x32xf32> to vector<128x32xf32>
    %11 = arith.addf %8, %10 : vector<128x32xf32>
    %12 = math.tanh %11 : vector<128x32xf32>
    %c0_10 = arith.constant 0 : index
    %c0_11 = arith.constant 0 : index
    %13 = vector.load %arg6[%c0_10, %c0_11] : memref<1x32xf32, #tpu.memory_space<vmem>>, vector<1x32xf32>
    %14 = vector.broadcast %13 : vector<1x32xf32> to vector<128x32xf32>
    %15 = arith.mulf %12, %14 : vector<128x32xf32>
    %cst_12 = arith.constant dense<0.000000e+00> : vector<128xf32>
    %16 = vector.multi_reduction <add>, %15, %cst_12 [1] : vector<128x32xf32> to vector<128xf32>
    %17 = vector.shape_cast %16 : vector<128xf32> to vector<128x1xf32>
    %c0_13 = arith.constant 0 : index
    %18 = memref.load %arg7[%c0_13] : memref<1xf32, #tpu.memory_space<smem>>
    %19 = vector.broadcast %18 : f32 to vector<128x1xf32>
    %20 = arith.addf %17, %19 : vector<128x1xf32>
    %21 = arith.negf %20 : vector<128x1xf32>
    %22 = math.exp %21 : vector<128x1xf32>
    %cst_14 = arith.constant 1.000000e+00 : f32
    %23 = vector.broadcast %cst_14 : f32 to vector<128x1xf32>
    %24 = arith.addf %23, %22 : vector<128x1xf32>
    %25 = arith.divf %23, %24 : vector<128x1xf32>
    %26 = tpu.transpose %25, [1, 0] : vector<128x1xf32> -> vector<1x128xf32>
    %c0_15 = arith.constant 0 : index
    %c0_16 = arith.constant 0 : index
    %27 = vector.load %arg8[%c0_15, %c0_16] : memref<1x128xf32, #tpu.memory_space<vmem>>, vector<1x128xf32>
    tpu.vector_store %arg8[%c0_15, %c0_16], %26 {strides = array<i32>} : memref<1x128xf32, #tpu.memory_space<vmem>>, vector<1x128xf32>,
    return
  }
  func.func @transform_0(%arg0: i32) -> (i32, i32) {
    %c0_i32 = arith.constant 0 : i32
    %c0_i32_0 = arith.constant 0 : i32
    return %arg0, %c0_i32 : i32, i32
  }
  func.func @transform_1(%arg0: i32) -> (i32, i32) {
    %c0_i32 = arith.constant 0 : i32
    %c0_i32_0 = arith.constant 0 : i32
    %c0_i32_1 = arith.constant 0 : i32
    return %c0_i32, %c0_i32_0 : i32, i32
  }
  func.func @transform_2(%arg0: i32) -> (i32, i32) {
    %c0_i32 = arith.constant 0 : i32
    %c0_i32_0 = arith.constant 0 : i32
    %c0_i32_1 = arith.constant 0 : i32
    return %c0_i32, %c0_i32_0 : i32, i32
  }
  func.func @transform_3(%arg0: i32) -> (i32, i32) {
    %c0_i32 = arith.constant 0 : i32
    %c0_i32_0 = arith.constant 0 : i32
    %c0_i32_1 = arith.constant 0 : i32
    return %c0_i32, %c0_i32_0 : i32, i32
  }
  func.func @transform_4(%arg0: i32) -> (i32, i32) {
    %c0_i32 = arith.constant 0 : i32
    %c0_i32_0 = arith.constant 0 : i32
    %c0_i32_1 = arith.constant 0 : i32
    return %c0_i32, %c0_i32_0 : i32, i32
  }
  func.func @transform_5(%arg0: i32) -> (i32, i32) {
    %c0_i32 = arith.constant 0 : i32
    %c0_i32_0 = arith.constant 0 : i32
    %c0_i32_1 = arith.constant 0 : i32
    return %c0_i32, %c0_i32_0 : i32, i32
  }
  func.func @transform_6(%arg0: i32) -> i32 {
    %c0_i32 = arith.constant 0 : i32
    %c0_i32_0 = arith.constant 0 : i32
    return %c0_i32 : i32
  }
  func.func @transform_7(%arg0: i32) -> (i32, i32) {
    %c0_i32 = arith.constant 0 : i32
    %c0_i32_0 = arith.constant 0 : i32
    return %c0_i32, %arg0 : i32, i32
  }
}

</mosaic_0001>

<bundles_post_ra>
// kernel: discriminator_forward.1
= control target key start
LH: loop header
LB: loop body
LE: loop exit
PB: predicated region body
PF: predicated region fallthrough
CT: control target
= control target key end

     0   :  { %vm54_vm0 = vcmask 261120   ;;  %s1252_s1 = inlined_call_operand.vmem [shape: f32[32,32], index: 1, kind: input, shape index: {}]   ;;  %s1253_s0 = inlined_call_operand.vmem [shape: f32[128,32], index: 0, kind: input, shape index: {}]   ;;  %s1254_s3 = inlined_call_operand.vmem [shape: f32[32,32], index: 3, kind: input, shape index: {}]   ;;  %s1255_s2 = inlined_call_operand.vmem [shape: f32[1,32], index: 2, kind: input, shape index: {}]   ;;  %s1256_s4 = inlined_call_operand.vmem [shape: f32[1,32], index: 4, kind: input, shape index: {}]   ;;  %s1257_s5 = inlined_call_operand.vmem [shape: f32[1,32], index: 5, kind: input, shape index: {}]   ;;  %s1258_s6 = inlined_call_operand.<no memory space> [shape: f32[1], index: 6, kind: input, shape index: {}]   ;;  %s1259_s7 = inlined_call_operand.vmem [shape: f32[1,128], index: 7, kind: output, shape index: {}]  }
   0x1   :  { %v43_v0 = vld [vmem:[%s1252_s1] sm:$0xff]  ;;  %v44_v1 = vld [vmem:[%s1252_s1 + $0x8] sm:$0xff]  ;;  %v45_v2 = vld [vmem:[%s1252_s1 + $0x10] sm:$0xff] }
   0x2   :  { %v861_v3 = vpack.c.bf16 %v44_v1, %v43_v0  ;;  %v46_v4 = vld [vmem:[%s1252_s1 + $0x18] sm:$0xff]  ;;  %v27_v5 = vld [vmem:[%s1253_s0] sm:$0xff]  ;;  %v28_v7 = vld [vmem:[%s1253_s0 + $0x8] sm:$0xff] }
   0x3   :  { %v865_v6 = vpack.c.bf16 %v46_v4, %v45_v2  ;;  %805 = vmatprep.mubr.msk.f32.mxu0 %vm54_vm0, %v27_v5  ;;  %v29_v8 = vld [vmem:[%s1253_s0 + $0x10] sm:$0xff]  ;;  %v30_v9 = vld [vmem:[%s1253_s0 + $0x18] sm:$0xff]  ;;  %v31_v10 = vld [vmem:[%s1253_s0 + $0x20] sm:$0xff] }
   0x4   :  { %862 = vmatprep.subr.bf16.mxu0 %v861_v3  ;;  %v32_v11 = vld [vmem:[%s1253_s0 + $0x28] sm:$0xff]  ;;  %v33_v12 = vld [vmem:[%s1253_s0 + $0x30] sm:$0xff]  ;;  %v34_v13 = vld [vmem:[%s1253_s0 + $0x38] sm:$0xff] }
   0x5   :  { %864 = vmatpush3.bf16.msra.mxu0 %v861_v3  ;;  %v35_v14 = vld [vmem:[%s1253_s0 + $0x40] sm:$0xff]  ;;  %v36_v15 = vld [vmem:[%s1253_s0 + $0x48] sm:$0xff]  ;;  %v37_v16 = vld [vmem:[%s1253_s0 + $0x50] sm:$0xff] }
   0x6   :  { %866 = vmatprep.subr.bf16.mxu0 %v865_v6  ;;  %v38_v17 = vld [vmem:[%s1253_s0 + $0x58] sm:$0xff]  ;;  %v39_v18 = vld [vmem:[%s1253_s0 + $0x60] sm:$0xff]  ;;  %v40_v19 = vld [vmem:[%s1253_s0 + $0x68] sm:$0xff] }
   0x7   :  { %v41_v20 = vld [vmem:[%s1253_s0 + $0x70] sm:$0xff]  ;;  %v42_v21 = vld [vmem:[%s1253_s0 + $0x78] sm:$0xff]  ;;  %v264_v22 = vld [vmem:[%s1254_s3] sm:$0xff] }
   0x8   :  { %v265_v23 = vld [vmem:[%s1254_s3 + $0x8] sm:$0xff]  ;;  %v266_v25 = vld [vmem:[%s1254_s3 + $0x10] sm:$0xff]  ;;  %v267_v26 = vld [vmem:[%s1254_s3 + $0x18] sm:$0xff] }
   0x9   :  { %868 = vmatpush3.bf16.msra.mxu0 %v865_v6  ;;  %v869_v24 = vpack.c.bf16 %v265_v23, %v264_v22  ;;  %v873_v27 = vpack.c.bf16 %v267_v26, %v266_v25  ;;  %v1136_v28 = vld [vmem:[%s1255_s2] ss:$0 sm:$0xff] }
   0xa   :  { %v1184_v26 = vld [vmem:[%s1257_s5] ss:$0 sm:$0xff] }
   0xb   :  { %870 = vmatprep.subr.bf16.mxu1 %v869_v24 }
   0xc   :  { %806 = vmatmul.mubr.msk.f32.vlgmr.msra.gmra.mrb[0].mxu0 %vm54_vm0, %v28_v7  ;;  %872 = vmatpush3.bf16.msra.mxu1 %v869_v24 }
   0xd   :  { %808 = vmatprep.mubr.msk.f32.mxu0 %vm54_vm0, %v29_v8  ;;  %874 = vmatprep.subr.bf16.mxu1 %v873_v27 }
  0x10   :  { %809 = vmatmul.mubr.msk.f32.gmra.mrb[2].mxu0 %vm54_vm0, %v30_v9  ;;  %876 = vmatpush3.bf16.msra.mxu1 %v873_v27 }
  0x11   :  { %811 = vmatprep.mubr.msk.f32.mxu0 %vm54_vm0, %v31_v10 }
  0x14   :  { %812 = vmatmul.mubr.msk.f32.gmra.mrb[4].mxu0 %vm54_vm0, %v32_v11 }
  0x15   :  { %814 = vmatprep.mubr.msk.f32.mxu0 %vm54_vm0, %v33_v12 }
  0x18   :  { %815 = vmatmul.mubr.msk.f32.gmra.mrb[6].mxu0 %vm54_vm0, %v34_v13  ;;  %v1173_v13 = vld [vmem:[%s1256_s4] ss:$0 sm:$0xff] }
  0x19   :  { %817 = vmatprep.mubr.msk.f32.mxu0 %vm54_vm0, %v35_v14 }
  0x1c   :  { %818 = vmatmul.mubr.msk.f32.gmra.mrb[8].mxu0 %vm54_vm0, %v36_v15 }
  0x1d   :  { %820 = vmatprep.mubr.msk.f32.mxu0 %vm54_vm0, %v37_v16 }
  0x20   :  { %821 = vmatmul.mubr.msk.f32.gmra.mrb[10].mxu0 %vm54_vm0, %v38_v17 }
  0x21   :  { %823 = vmatprep.mubr.msk.f32.mxu0 %vm54_vm0, %v39_v18 }
  0x24   :  { %824 = vmatmul.mubr.msk.f32.gmra.mrb[12].mxu0 %vm54_vm0, %v40_v19 }
  0x25   :  { %826 = vmatprep.mubr.msk.f32.mxu0 %vm54_vm0, %v41_v20 }
  0x28   :  { %827 = vmatmul.mubr.msk.f32.gmra.mrb[14].mxu0 %vm54_vm0, %v42_v21 }
  0xdf   :  { %v807_v29 = vpop.f32.mrb[0].mxu0 }
  0xe0   :  { %v175_v30 = vadd.f32 %v807_v29, %v1136_v28  ;;  %v169_v31 = vpop.f32.mrb[1].mxu0 }
  0xe1   :  { %v170_v32 = vadd.f32 %v1136_v28, %v169_v31 }
  0xe3   :  { %877 = vtanh.f32 %v170_v32  ;;  %v810_v33 = vpop.f32.mrb[2].mxu0 }
  0xe4   :  { %879 = vtanh.f32 %v175_v30  ;;  %v185_v34 = vadd.f32 %v810_v33, %v1136_v28  ;;  %v179_v35 = vpop.f32.mrb[3].mxu0 }
  0xe5   :  { %v180_v36 = vadd.f32 %v1136_v28, %v179_v35 }
  0xe6   :  { %881 = vtanh.f32 %v185_v34 }
  0xe7   :  { %883 = vtanh.f32 %v180_v36  ;;  %v813_v37 = vpop.f32.mrb[4].mxu0 }
  0xe8   :  { %v195_v38 = vadd.f32 %v813_v37, %v1136_v28  ;;  %v189_v39 = vpop.f32.mrb[5].mxu0 }
  0xe9   :  { %v190_v40 = vadd.f32 %v1136_v28, %v189_v39 }
  0xea   :  { %885 = vtanh.f32 %v195_v38 }
  0xeb   :  { %887 = vtanh.f32 %v190_v40  ;;  %v816_v41 = vpop.f32.mrb[6].mxu0 }
  0xec   :  { %v205_v42 = vadd.f32 %v816_v41, %v1136_v28  ;;  %v199_v43 = vpop.f32.mrb[7].mxu0 }
  0xed   :  { %v878_v44 = vpop.eup %877  ;;  %v200_v45 = vadd.f32 %v1136_v28, %v199_v43 }
  0xee   :  { %v880_v46 = vpop.eup %879  ;;  %837 = vmatprep.mubr.msk.f32.mxu1 %vm54_vm0, %v878_v44  ;;  %889 = vtanh.f32 %v205_v42 }
  0xef   :  { %838 = vmatmul.mubr.msk.f32.vlgmr.msra.gmra.mrb[0].mxu1 %vm54_vm0, %v880_v46  ;;  %891 = vtanh.f32 %v200_v45  ;;  %v819_v47 = vpop.f32.mrb[8].mxu0 }
  0xf0   :  { %v882_v48 = vpop.eup %881  ;;  %v215_v49 = vadd.f32 %v819_v47, %v1136_v28  ;;  %v209_v50 = vpop.f32.mrb[9].mxu0 }
  0xf1   :  { %v884_v51 = vpop.eup %883  ;;  %v210_v52 = vadd.f32 %v1136_v28, %v209_v50 }
  0xf2   :  { %840 = vmatprep.mubr.msk.f32.mxu1 %vm54_vm0, %v884_v51  ;;  %893 = vtanh.f32 %v215_v49 }
  0xf3   :  { %841 = vmatmul.mubr.msk.f32.gmra.mrb[2].mxu1 %vm54_vm0, %v882_v48  ;;  %895 = vtanh.f32 %v210_v52  ;;  %v822_v53 = vpop.f32.mrb[10].mxu0 }
  0xf4   :  { %v886_v54 = vpop.eup %885  ;;  %v225_v55 = vadd.f32 %v822_v53, %v1136_v28  ;;  %v219_v56 = vpop.f32.mrb[11].mxu0 }
  0xf5   :  { %v888_v57 = vpop.eup %887  ;;  %v220_v58 = vadd.f32 %v1136_v28, %v219_v56 }
  0xf6   :  { %843 = vmatprep.mubr.msk.f32.mxu1 %vm54_vm0, %v888_v57  ;;  %897 = vtanh.f32 %v225_v55 }
  0xf7   :  { %844 = vmatmul.mubr.msk.f32.gmra.mrb[4].mxu1 %vm54_vm0, %v886_v54  ;;  %899 = vtanh.f32 %v220_v58  ;;  %v825_v59 = vpop.f32.mrb[12].mxu0 }
  0xf8   :  { %v890_v60 = vpop.eup %889  ;;  %v235_v61 = vadd.f32 %v825_v59, %v1136_v28  ;;  %v229_v62 = vpop.f32.mrb[13].mxu0 }
  0xf9   :  { %v892_v63 = vpop.eup %891  ;;  %v230_v0 = vadd.f32 %v1136_v28, %v229_v62 }
  0xfa   :  { %846 = vmatprep.mubr.msk.f32.mxu1 %vm54_vm0, %v892_v63  ;;  %901 = vtanh.f32 %v235_v61 }
  0xfb   :  { %847 = vmatmul.mubr.msk.f32.gmra.mrb[6].mxu1 %vm54_vm0, %v890_v60  ;;  %903 = vtanh.f32 %v230_v0  ;;  %v828_v1 = vpop.f32.mrb[14].mxu0 }
  0xfc   :  { %v894_v2 = vpop.eup %893  ;;  %v245_v3 = vadd.f32 %v828_v1, %v1136_v28  ;;  %v239_v4 = vpop.f32.mrb[15].mxu0 }
  0xfd   :  { %v896_v5 = vpop.eup %895  ;;  %v240_v6 = vadd.f32 %v1136_v28, %v239_v4 }
  0xfe   :  { %849 = vmatprep.mubr.msk.f32.mxu1 %vm54_vm0, %v896_v5  ;;  %905 = vtanh.f32 %v245_v3 }
  0xff   :  { %850 = vmatmul.mubr.msk.f32.gmra.mrb[8].mxu1 %vm54_vm0, %v894_v2  ;;  %907 = vtanh.f32 %v240_v6 }
 0x100   :  { %v898_v7 = vpop.eup %897 }
 0x101   :  { %v900_v8 = vpop.eup %899 }
 0x102   :  { %852 = vmatprep.mubr.msk.f32.mxu1 %vm54_vm0, %v900_v8 }
 0x103   :  { %853 = vmatmul.mubr.msk.f32.gmra.mrb[10].mxu1 %vm54_vm0, %v898_v7 }
 0x104   :  { %v902_v9 = vpop.eup %901 }
 0x105   :  { %v904_v10 = vpop.eup %903 }
 0x106   :  { %855 = vmatprep.mubr.msk.f32.mxu1 %vm54_vm0, %v904_v10 }
 0x107   :  { %856 = vmatmul.mubr.msk.f32.gmra.mrb[12].mxu1 %vm54_vm0, %v902_v9 }
 0x108   :  { %v906_v11 = vpop.eup %905 }
 0x109   :  { %v908_v12 = vpop.eup %907 }
 0x10a   :  { %858 = vmatprep.mubr.msk.f32.mxu1 %vm54_vm0, %v908_v12 }
 0x10b   :  { %859 = vmatmul.mubr.msk.f32.gmra.mrb[14].mxu1 %vm54_vm0, %v906_v11 }
 0x1c2   :  { %v839_v14 = vpop.f32.mrb[0].mxu1 }
 0x1c3   :  { %v395_v15 = vadd.f32 %v839_v14, %v1173_v13  ;;  %v389_v16 = vpop.f32.mrb[1].mxu1 }
 0x1c4   :  { %v390_v17 = vadd.f32 %v1173_v13, %v389_v16 }
 0x1c5   :  { %909 = vtanh.f32 %v395_v15 }
 0x1c6   :  { %911 = vtanh.f32 %v390_v17  ;;  %v842_v18 = vpop.f32.mrb[2].mxu1 }
 0x1c7   :  { %v405_v19 = vadd.f32 %v842_v18, %v1173_v13  ;;  %v399_v20 = vpop.f32.mrb[3].mxu1 }
 0x1c8   :  { %v400_v21 = vadd.f32 %v1173_v13, %v399_v20 }
 0x1c9   :  { %913 = vtanh.f32 %v405_v19 }
 0x1ca   :  { %915 = vtanh.f32 %v400_v21  ;;  %v845_v22 = vpop.f32.mrb[4].mxu1 }
 0x1cb   :  { %v415_v23 = vadd.f32 %v845_v22, %v1173_v13  ;;  %v409_v24 = vpop.f32.mrb[5].mxu1 }
 0x1cc   :  { %v410_v25 = vadd.f32 %v1173_v13, %v409_v24 }
 0x1cd   :  { %917 = vtanh.f32 %v415_v23 }
 0x1ce   :  { %919 = vtanh.f32 %v410_v25  ;;  %v848_v27 = vpop.f32.mrb[6].mxu1 }
 0x1cf   :  { %v910_v28 = vpop.eup %909  ;;  %v425_v29 = vadd.f32 %v848_v27, %v1173_v13  ;;  %v419_v30 = vpop.f32.mrb[7].mxu1 }
 0x1d0   :  { %v912_v31 = vpop.eup %911  ;;  %v420_v32 = vadd.f32 %v1173_v13, %v419_v30  ;;  %v492_v37 = vmul.f32 %v910_v28, %v1184_v26 }
 0x1d1   :  { %v491_v33 = vmul.f32 %v912_v31, %v1184_v26  ;;  %921 = vtanh.f32 %v425_v29 }
 0x1d2   :  { %923 = vtanh.f32 %v420_v32  ;;  %v851_v34 = vpop.f32.mrb[8].mxu1  ;;  %v510_v46 = vsel %vm54_vm0, %v492_v37, 0.0  ;;  %v1231_v32 = vstv %s1258_s6 }
 0x1d3   :  { %v914_v35 = vpop.eup %913  ;;  %v507_v36 = vsel %vm54_vm0, %v491_v33, 0.0  ;;  %v435_v38 = vadd.f32 %v851_v34, %v1173_v13  ;;  %v429_v39 = vpop.f32.mrb[9].mxu1 }
 0x1d4   :  { %v916_v40 = vpop.eup %915  ;;  %508 = vadd.xlane.f32.xlu0 %v507_v36  ;;  %v430_v41 = vadd.f32 %v1173_v13, %v429_v39  ;;  %v494_v47 = vmul.f32 %v914_v35, %v1184_v26 }
 0x1d5   :  { %v493_v42 = vmul.f32 %v916_v40, %v1184_v26  ;;  %925 = vtanh.f32 %v435_v38 }
 0x1d6   :  { %927 = vtanh.f32 %v430_v41  ;;  %v854_v43 = vpop.f32.mrb[10].mxu1  ;;  %v516_v56 = vsel %vm54_vm0, %v494_v47, 0.0 }
 0x1d7   :  { %v918_v44 = vpop.eup %917  ;;  %v513_v45 = vsel %vm54_vm0, %v493_v42, 0.0  ;;  %v445_v48 = vadd.f32 %v854_v43, %v1173_v13  ;;  %v439_v49 = vpop.f32.mrb[11].mxu1 }
 0x1d8   :  { %v920_v50 = vpop.eup %919  ;;  %514 = vadd.xlane.f32.xlu1 %v513_v45  ;;  %511 = vadd.xlane.f32.xlu0 %v510_v46  ;;  %v440_v51 = vadd.f32 %v1173_v13, %v439_v49  ;;  %v496_v52 = vmul.f32 %v918_v44, %v1184_v26 }
 0x1d9   :  { %v495_v53 = vmul.f32 %v920_v50, %v1184_v26  ;;  %929 = vtanh.f32 %v445_v48 }
 0x1da   :  { %931 = vtanh.f32 %v440_v51  ;;  %v857_v54 = vpop.f32.mrb[12].mxu1  ;;  %v522_v62 = vsel %vm54_vm0, %v496_v52, 0.0 }
 0x1db   :  { %v922_v55 = vpop.eup %921  ;;  %v519_v57 = vsel %vm54_vm0, %v495_v53, 0.0  ;;  %v455_v58 = vadd.f32 %v857_v54, %v1173_v13  ;;  %v449_v59 = vpop.f32.mrb[13].mxu1 }
 0x1dc   :  { %v924_v60 = vpop.eup %923  ;;  %517 = vadd.xlane.f32.xlu1 %v516_v56  ;;  %520 = vadd.xlane.f32.xlu0 %v519_v57  ;;  %v450_v61 = vadd.f32 %v1173_v13, %v449_v59  ;;  %v498_v63 = vmul.f32 %v922_v55, %v1184_v26 }
 0x1dd   :  { %v497_v0 = vmul.f32 %v924_v60, %v1184_v26  ;;  %933 = vtanh.f32 %v455_v58 }
 0x1de   :  { %935 = vtanh.f32 %v450_v61  ;;  %v860_v1 = vpop.f32.mrb[14].mxu1  ;;  %v528_v8 = vsel %vm54_vm0, %v498_v63, 0.0 }
 0x1df   :  { %v926_v2 = vpop.eup %925  ;;  %v525_v3 = vsel %vm54_vm0, %v497_v0, 0.0  ;;  %v465_v4 = vadd.f32 %v860_v1, %v1173_v13  ;;  %v459_v5 = vpop.f32.mrb[15].mxu1 }
 0x1e0   :  { %v928_v6 = vpop.eup %927  ;;  %523 = vadd.xlane.f32.xlu1 %v522_v62  ;;  %526 = vadd.xlane.f32.xlu0 %v525_v3  ;;  %v460_v7 = vadd.f32 %v1173_v13, %v459_v5  ;;  %v500_v9 = vmul.f32 %v926_v2, %v1184_v26 }
 0x1e1   :  { %v499_v10 = vmul.f32 %v928_v6, %v1184_v26  ;;  %937 = vtanh.f32 %v465_v4 }
 0x1e2   :  { %939 = vtanh.f32 %v460_v7  ;;  %v534_v15 = vsel %vm54_vm0, %v500_v9, 0.0 }
 0x1e3   :  { %v930_v11 = vpop.eup %929  ;;  %v531_v12 = vsel %vm54_vm0, %v499_v10, 0.0 }
 0x1e4   :  { %v932_v14 = vpop.eup %931  ;;  %529 = vadd.xlane.f32.xlu1 %v528_v8  ;;  %532 = vadd.xlane.f32.xlu0 %v531_v12  ;;  %v502_v16 = vmul.f32 %v930_v11, %v1184_v26 }
 0x1e5   :  { %v501_v13 = vmul.f32 %v932_v14, %v1184_v26 }
 0x1e6   :  { %v540_v20 = vsel %vm54_vm0, %v502_v16, 0.0 }
 0x1e7   :  { %v934_v17 = vpop.eup %933  ;;  %v537_v18 = vsel %vm54_vm0, %v501_v13, 0.0 }
 0x1e8   :  { %v936_v19 = vpop.eup %935  ;;  %535 = vadd.xlane.f32.xlu1 %v534_v15  ;;  %538 = vadd.xlane.f32.xlu0 %v537_v18  ;;  %v504_v21 = vmul.f32 %v934_v17, %v1184_v26 }
 0x1e9   :  { %v503_v22 = vmul.f32 %v936_v19, %v1184_v26 }
 0x1ea   :  { %v546_v27 = vsel %vm54_vm0, %v504_v21, 0.0 }
 0x1eb   :  { %v938_v23 = vpop.eup %937  ;;  %v543_v24 = vsel %vm54_vm0, %v503_v22, 0.0 }
 0x1ec   :  { %v940_v25 = vpop.eup %939  ;;  %541 = vadd.xlane.f32.xlu1 %v540_v20  ;;  %544 = vadd.xlane.f32.xlu0 %v543_v24  ;;  %v506_v28 = vmul.f32 %v938_v23, %v1184_v26 }
 0x1ed   :  { %v505_v29 = vmul.f32 %v940_v25, %v1184_v26 }
 0x1ee   :  { %v552_v31 = vsel %vm54_vm0, %v506_v28, 0.0 }
 0x1ef   :  { %v549_v30 = vsel %vm54_vm0, %v505_v29, 0.0 }
 0x1f0   :  { %547 = vadd.xlane.f32.xlu1 %v546_v27  ;;  %550 = vadd.xlane.f32.xlu0 %v549_v30 }
 0x1f4   :  { %553 = vadd.xlane.f32.xlu1 %v552_v31 }
 0x261   :  { %v509_v33 = vpop.xlane.xlu0 %508 }
 0x262   :  { %v557_v34 = vadd.f32 %v1231_v32, %v509_v33 }
 0x264   :  { %v741_v35 = vmul.f32 -1.442695, %v557_v34 }
 0x265   :  { %v515_v36 = vpop.xlane.xlu1 %514  ;;  %v512_v37 = vpop.xlane.xlu0 %511 }
 0x266   :  { %941 = vpow2.f32 %v741_v35  ;;  %v559_v26 = vadd.f32 %v1231_v32, %v515_v36  ;;  %v558_v38 = vadd.f32 %v1231_v32, %v512_v37 }
 0x268   :  { %v743_v39 = vmul.f32 -1.442695, %v559_v26  ;;  %v742_v40 = vmul.f32 -1.442695, %v558_v38 }
 0x269   :  { %v518_v41 = vpop.xlane.xlu1 %517  ;;  %v521_v42 = vpop.xlane.xlu0 %520 }
 0x26a   :  { %943 = vpow2.f32 %v743_v39  ;;  %v560_v43 = vadd.f32 %v1231_v32, %v518_v41  ;;  %v561_v44 = vadd.f32 %v1231_v32, %v521_v42 }
 0x26b   :  { %945 = vpow2.f32 %v742_v40 }
 0x26c   :  { %v744_v45 = vmul.f32 -1.442695, %v560_v43  ;;  %v745_v47 = vmul.f32 -1.442695, %v561_v44 }
 0x26d   :  { %v524_v46 = vpop.xlane.xlu1 %523  ;;  %v527_v50 = vpop.xlane.xlu0 %526 }
 0x26e   :  { %947 = vpow2.f32 %v744_v45  ;;  %v562_v48 = vadd.f32 %v1231_v32, %v524_v46  ;;  %v563_v53 = vadd.f32 %v1231_v32, %v527_v50 }
 0x26f   :  { %949 = vpow2.f32 %v745_v47 }
 0x270   :  { %v942_v49 = vpop.eup %941  ;;  %v746_v52 = vmul.f32 -1.442695, %v562_v48  ;;  %v747_v59 = vmul.f32 -1.442695, %v563_v53 }
 0x271   :  { %v621_v51 = vadd.f32 1.0, %v942_v49  ;;  %v530_v55 = vpop.xlane.xlu1 %529  ;;  %v533_v61 = vpop.xlane.xlu0 %532 }
 0x272   :  { %v564_v58 = vadd.f32 %v1231_v32, %v530_v55  ;;  %v565_v0 = vadd.f32 %v1231_v32, %v533_v61 }
 0x273   :  { %951 = vrcp.f32 %v621_v51 }
 0x274   :  { %v944_v54 = vpop.eup %943  ;;  %953 = vpow2.f32 %v746_v52  ;;  %v748_v63 = vmul.f32 -1.442695, %v564_v58  ;;  %v749_v6 = vmul.f32 -1.442695, %v565_v0 }
 0x275   :  { %v946_v56 = vpop.eup %945  ;;  %v623_v60 = vadd.f32 1.0, %v944_v54  ;;  %v536_v3 = vpop.xlane.xlu1 %535 }
 0x276   :  { %v622_v57 = vadd.f32 1.0, %v946_v56  ;;  %v566_v5 = vadd.f32 %v1231_v32, %v536_v3  ;;  %v539_v8 = vpop.xlane.xlu0 %538 }
 0x277   :  { %v567_v12 = vadd.f32 %v1231_v32, %v539_v8 }
 0x278   :  { %955 = vrcp.f32 %v622_v57  ;;  %v948_v62 = vpop.eup %947  ;;  %v750_v11 = vmul.f32 -1.442695, %v566_v5 }
 0x279   :  { %957 = vpow2.f32 %v747_v59  ;;  %v950_v1 = vpop.eup %949  ;;  %v624_v2 = vadd.f32 1.0, %v948_v62  ;;  %v542_v15 = vpop.xlane.xlu1 %541  ;;  %v751_v18 = vmul.f32 -1.442695, %v567_v12 }
 0x27a   :  { %959 = vrcp.f32 %v623_v60  ;;  %v625_v7 = vadd.f32 1.0, %v950_v1  ;;  %v568_v17 = vadd.f32 %v1231_v32, %v542_v15  ;;  %v545_v20 = vpop.xlane.xlu0 %544 }
 0x27b   :  { %961 = vpow2.f32 %v748_v63  ;;  %v569_v24 = vadd.f32 %v1231_v32, %v545_v20 }
 0x27c   :  { %963 = vrcp.f32 %v624_v2  ;;  %v752_v23 = vmul.f32 -1.442695, %v568_v17 }
 0x27d   :  { %v952_v4 = vpop.eup %951  ;;  %965 = vpow2.f32 %v749_v6  ;;  %v548_v27 = vpop.xlane.xlu1 %547  ;;  %v753_v31 = vmul.f32 -1.442695, %v569_v24 }
 0x27e   :  { %669 = vxpose.xlu0.b32.start [1/16] (narrow) %v952_v4, 8  ;;  %v954_v9 = vpop.eup %953  ;;  %967 = vrcp.f32 %v625_v7  ;;  %v570_v30 = vadd.f32 %v1231_v32, %v548_v27  ;;  %v551_v34 = vpop.xlane.xlu0 %550 }
 0x27f   :  { %v626_v14 = vadd.f32 1.0, %v954_v9  ;;  %969 = vpow2.f32 %v750_v11  ;;  %v571_v26 = vadd.f32 %v1231_v32, %v551_v34 }
 0x280   :  { %v754_v37 = vmul.f32 -1.442695, %v570_v30 }
 0x281   :  { %971 = vrcp.f32 %v626_v14  ;;  %v554_v39 = vpop.xlane.xlu1 %553  ;;  %v755_v43 = vmul.f32 -1.442695, %v571_v26 }
 0x282   :  { %v956_v10 = vpop.eup %955  ;;  %973 = vpow2.f32 %v751_v18  ;;  %v572_v42 = vadd.f32 %v1231_v32, %v554_v39 }
 0x283   :  { %670 = vxpose.xlu0.b32.cont [2/16] (narrow) %v956_v10, 8  ;;  %v958_v16 = vpop.eup %957 }
 0x284   :  { %v960_v13 = vpop.eup %959  ;;  %v627_v19 = vadd.f32 1.0, %v958_v16  ;;  %v756_v47 = vmul.f32 -1.442695, %v572_v42 }
 0x285   :  { %v962_v21 = vpop.eup %961 }
 0x286   :  { %v964_v22 = vpop.eup %963  ;;  %v628_v25 = vadd.f32 1.0, %v962_v21  ;;  %975 = vrcp.f32 %v627_v19 }
 0x287   :  { %671 = vxpose.xlu0.b32.cont [3/16] (narrow) %v960_v13, 8  ;;  %v966_v28 = vpop.eup %965  ;;  %977 = vpow2.f32 %v752_v23 }
 0x288   :  { %v968_v29 = vpop.eup %967  ;;  %979 = vrcp.f32 %v628_v25  ;;  %v629_v33 = vadd.f32 1.0, %v966_v28 }
 0x289   :  { %v970_v35 = vpop.eup %969  ;;  %981 = vpow2.f32 %v753_v31 }
 0x28a   :  { %v630_v38 = vadd.f32 1.0, %v970_v35  ;;  %983 = vrcp.f32 %v629_v33 }
 0x28b   :  { %672 = vxpose.xlu0.b32.cont [4/16] (narrow) %v964_v22, 8  ;;  %v972_v36 = vpop.eup %971  ;;  %985 = vpow2.f32 %v754_v37 }
 0x28c   :  { %v974_v40 = vpop.eup %973  ;;  %987 = vrcp.f32 %v630_v38 }
 0x28d   :  { %v631_v44 = vadd.f32 1.0, %v974_v40  ;;  %989 = vpow2.f32 %v755_v43 }
 0x28f   :  { %673 = vxpose.xlu0.b32.cont [5/16] (narrow) %v968_v29, 8  ;;  %991 = vrcp.f32 %v631_v44 }
 0x290   :  { %v976_v41 = vpop.eup %975  ;;  %993 = vpow2.f32 %v756_v47 }
 0x291   :  { %v978_v45 = vpop.eup %977 }
 0x292   :  { %v980_v46 = vpop.eup %979  ;;  %v632_v48 = vadd.f32 1.0, %v978_v45 }
 0x293   :  { %674 = vxpose.xlu0.b32.cont [6/16] (narrow) %v972_v36, 8  ;;  %v982_v49 = vpop.eup %981 }
 0x294   :  { %v984_v50 = vpop.eup %983  ;;  %995 = vrcp.f32 %v632_v48  ;;  %v633_v51 = vadd.f32 1.0, %v982_v49 }
 0x295   :  { %v986_v52 = vpop.eup %985 }
 0x296   :  { %v988_v53 = vpop.eup %987  ;;  %v634_v32 = vadd.f32 1.0, %v986_v52  ;;  %997 = vrcp.f32 %v633_v51 }
 0x297   :  { %675 = vxpose.xlu0.b32.cont [7/16] (narrow) %v976_v41, 8  ;;  %v990_v54 = vpop.eup %989 }
 0x298   :  { %999 = vrcp.f32 %v634_v32  ;;  %v635_v56 = vadd.f32 1.0, %v990_v54 }
 0x299   :  { %v992_v55 = vpop.eup %991 }
 0x29a   :  { %v994_v57 = vpop.eup %993  ;;  %1001 = vrcp.f32 %v635_v56 }
 0x29b   :  { %676 = vxpose.xlu0.b32.cont [8/16] (narrow) %v980_v46, 8  ;;  %v636_v59 = vadd.f32 1.0, %v994_v57 }
 0x29d   :  { %1003 = vrcp.f32 %v636_v59 }
 0x29e   :  { %v996_v58 = vpop.eup %995 }
 0x29f   :  { %677 = vxpose.xlu0.b32.cont [9/16] (narrow) %v984_v50, 8 }
 0x2a0   :  { %v998_v60 = vpop.eup %997 }
 0x2a2   :  { %v1000_v61 = vpop.eup %999 }
 0x2a3   :  { %678 = vxpose.xlu0.b32.cont [10/16] (narrow) %v988_v53, 8 }
 0x2a4   :  { %v1002_v62 = vpop.eup %1001 }
 0x2a7   :  { %679 = vxpose.xlu0.b32.cont [11/16] (narrow) %v992_v55, 8  ;;  %v1004_v63 = vpop.eup %1003 }
 0x2ab   :  { %680 = vxpose.xlu0.b32.cont [12/16] (narrow) %v996_v58, 8 }
 0x2af   :  { %681 = vxpose.xlu0.b32.cont [13/16] (narrow) %v998_v60, 8 }
 0x2b3   :  { %682 = vxpose.xlu0.b32.cont [14/16] (narrow) %v1000_v61, 8 }
 0x2b7   :  { %683 = vxpose.xlu0.b32.cont [15/16] (narrow) %v1002_v62, 8 }
 0x2bb   :  { %684 = vxpose.xlu0.b32.end [16/16] (narrow) %v1004_v63, 8 }
 0x2ff   :  { %v685_v0 = vpop.trf.xlu0 }
 0x300   :  { %701 = vst [vmem:[%s1259_s7] sm:$0x1] %v685_v0 }

// kernel: discriminator_forward.1
= control target key start
LH: loop header
LB: loop body
LE: loop exit
PB: predicated region body
PF: predicated region fallthrough
CT: control target
= control target key end

     0   :  { %vm54_vm0 = vcmask 261120   ;;  %s1252_s1 = inlined_call_operand.vmem [shape: f32[32,32], index: 1, kind: input, shape index: {}]   ;;  %s1253_s0 = inlined_call_operand.vmem [shape: f32[128,32], index: 0, kind: input, shape index: {}]   ;;  %s1254_s3 = inlined_call_operand.vmem [shape: f32[32,32], index: 3, kind: input, shape index: {}]   ;;  %s1255_s2 = inlined_call_operand.vmem [shape: f32[1,32], index: 2, kind: input, shape index: {}]   ;;  %s1256_s4 = inlined_call_operand.vmem [shape: f32[1,32], index: 4, kind: input, shape index: {}]   ;;  %s1257_s5 = inlined_call_operand.vmem [shape: f32[1,32], index: 5, kind: input, shape index: {}]   ;;  %s1258_s6 = inlined_call_operand.<no memory space> [shape: f32[1], index: 6, kind: input, shape index: {}]   ;;  %s1259_s7 = inlined_call_operand.vmem [shape: f32[1,128], index: 7, kind: output, shape index: {}]  }
   0x1   :  { %v43_v0 = vld [vmem:[%s1252_s1] sm:$0xff]  ;;  %v44_v1 = vld [vmem:[%s1252_s1 + $0x8] sm:$0xff]  ;;  %v45_v2 = vld [vmem:[%s1252_s1 + $0x10] sm:$0xff] }
   0x2   :  { %v861_v3 = vpack.c.bf16 %v44_v1, %v43_v0  ;;  %v46_v4 = vld [vmem:[%s1252_s1 + $0x18] sm:$0xff]  ;;  %v27_v5 = vld [vmem:[%s1253_s0] sm:$0xff]  ;;  %v28_v7 = vld [vmem:[%s1253_s0 + $0x8] sm:$0xff] }
   0x3   :  { %v865_v6 = vpack.c.bf16 %v46_v4, %v45_v2  ;;  %805 = vmatprep.mubr.msk.f32.mxu0 %vm54_vm0, %v27_v5  ;;  %v29_v8 = vld [vmem:[%s1253_s0 + $0x10] sm:$0xff]  ;;  %v30_v9 = vld [vmem:[%s1253_s0 + $0x18] sm:$0xff]  ;;  %v31_v10 = vld [vmem:[%s1253_s0 + $0x20] sm:$0xff] }
   0x4   :  { %862 = vmatprep.subr.bf16.mxu0 %v861_v3  ;;  %v32_v11 = vld [vmem:[%s1253_s0 + $0x28] sm:$0xff]  ;;  %v33_v12 = vld [vmem:[%s1253_s0 + $0x30] sm:$0xff]  ;;  %v34_v13 = vld [vmem:[%s1253_s0 + $0x38] sm:$0xff] }
   0x5   :  { %864 = vmatpush3.bf16.msra.mxu0 %v861_v3  ;;  %v35_v14 = vld [vmem:[%s1253_s0 + $0x40] sm:$0xff]  ;;  %v36_v15 = vld [vmem:[%s1253_s0 + $0x48] sm:$0xff]  ;;  %v37_v16 = vld [vmem:[%s1253_s0 + $0x50] sm:$0xff] }
   0x6   :  { %866 = vmatprep.subr.bf16.mxu0 %v865_v6  ;;  %v38_v17 = vld [vmem:[%s1253_s0 + $0x58] sm:$0xff]  ;;  %v39_v18 = vld [vmem:[%s1253_s0 + $0x60] sm:$0xff]  ;;  %v40_v19 = vld [vmem:[%s1253_s0 + $0x68] sm:$0xff] }
   0x7   :  { %v41_v20 = vld [vmem:[%s1253_s0 + $0x70] sm:$0xff]  ;;  %v42_v21 = vld [vmem:[%s1253_s0 + $0x78] sm:$0xff]  ;;  %v264_v22 = vld [vmem:[%s1254_s3] sm:$0xff] }
   0x8   :  { %v265_v23 = vld [vmem:[%s1254_s3 + $0x8] sm:$0xff]  ;;  %v266_v25 = vld [vmem:[%s1254_s3 + $0x10] sm:$0xff]  ;;  %v267_v26 = vld [vmem:[%s1254_s3 + $0x18] sm:$0xff] }
   0x9   :  { %868 = vmatpush3.bf16.msra.mxu0 %v865_v6  ;;  %v869_v24 = vpack.c.bf16 %v265_v23, %v264_v22  ;;  %v873_v27 = vpack.c.bf16 %v267_v26, %v266_v25  ;;  %v1136_v28 = vld [vmem:[%s1255_s2] ss:$0 sm:$0xff] }
   0xa   :  { %v1184_v26 = vld [vmem:[%s1257_s5] ss:$0 sm:$0xff] }
   0xb   :  { %870 = vmatprep.subr.bf16.mxu1 %v869_v24 }
   0xc   :  { %806 = vmatmul.mubr.msk.f32.vlgmr.msra.gmra.mrb[0].mxu0 %vm54_vm0, %v28_v7  ;;  %872 = vmatpush3.bf16.msra.mxu1 %v869_v24 }
   0xd   :  { %808 = vmatprep.mubr.msk.f32.mxu0 %vm54_vm0, %v29_v8  ;;  %874 = vmatprep.subr.bf16.mxu1 %v873_v27 }
  0x10   :  { %809 = vmatmul.mubr.msk.f32.gmra.mrb[2].mxu0 %vm54_vm0, %v30_v9  ;;  %876 = vmatpush3.bf16.msra.mxu1 %v873_v27 }
  0x11   :  { %811 = vmatprep.mubr.msk.f32.mxu0 %vm54_vm0, %v31_v10 }
  0x14   :  { %812 = vmatmul.mubr.msk.f32.gmra.mrb[4].mxu0 %vm54_vm0, %v32_v11 }
  0x15   :  { %814 = vmatprep.mubr.msk.f32.mxu0 %vm54_vm0, %v33_v12 }
  0x18   :  { %815 = vmatmul.mubr.msk.f32.gmra.mrb[6].mxu0 %vm54_vm0, %v34_v13  ;;  %v1173_v13 = vld [vmem:[%s1256_s4] ss:$0 sm:$0xff] }
  0x19   :  { %817 = vmatprep.mubr.msk.f32.mxu0 %vm54_vm0, %v35_v14 }
  0x1c   :  { %818 = vmatmul.mubr.msk.f32.gmra.mrb[8].mxu0 %vm54_vm0, %v36_v15 }
  0x1d   :  { %820 = vmatprep.mubr.msk.f32.mxu0 %vm54_vm0, %v37_v16 }
  0x20   :  { %821 = vmatmul.mubr.msk.f32.gmra.mrb[10].mxu0 %vm54_vm0, %v38_v17 }
  0x21   :  { %823 = vmatprep.mubr.msk.f32.mxu0 %vm54_vm0, %v39_v18 }
  0x24   :  { %824 = vmatmul.mubr.msk.f32.gmra.mrb[12].mxu0 %vm54_vm0, %v40_v19 }
  0x25   :  { %826 = vmatprep.mubr.msk.f32.mxu0 %vm54_vm0, %v41_v20 }
  0x28   :  { %827 = vmatmul.mubr.msk.f32.gmra.mrb[14].mxu0 %vm54_vm0, %v42_v21 }
  0xdf   :  { %v807_v29 = vpop.f32.mrb[0].mxu0 }
  0xe0   :  { %v175_v30 = vadd.f32 %v807_v29, %v1136_v28  ;;  %v169_v31 = vpop.f32.mrb[1].mxu0 }
  0xe1   :  { %v170_v32 = vadd.f32 %v1136_v28, %v169_v31 }
  0xe3   :  { %877 = vtanh.f32 %v170_v32  ;;  %v810_v33 = vpop.f32.mrb[2].mxu0 }
  0xe4   :  { %879 = vtanh.f32 %v175_v30  ;;  %v185_v34 = vadd.f32 %v810_v33, %v1136_v28  ;;  %v179_v35 = vpop.f32.mrb[3].mxu0 }
  0xe5   :  { %v180_v36 = vadd.f32 %v1136_v28, %v179_v35 }
  0xe6   :  { %881 = vtanh.f32 %v185_v34 }
  0xe7   :  { %883 = vtanh.f32 %v180_v36  ;;  %v813_v37 = vpop.f32.mrb[4].mxu0 }
  0xe8   :  { %v195_v38 = vadd.f32 %v813_v37, %v1136_v28  ;;  %v189_v39 = vpop.f32.mrb[5].mxu0 }
  0xe9   :  { %v190_v40 = vadd.f32 %v1136_v28, %v189_v39 }
  0xea   :  { %885 = vtanh.f32 %v195_v38 }
  0xeb   :  { %887 = vtanh.f32 %v190_v40  ;;  %v816_v41 = vpop.f32.mrb[6].mxu0 }
  0xec   :  { %v205_v42 = vadd.f32 %v816_v41, %v1136_v28  ;;  %v199_v43 = vpop.f32.mrb[7].mxu0 }
  0xed   :  { %v878_v44 = vpop.eup %877  ;;  %v200_v45 = vadd.f32 %v1136_v28, %v199_v43 }
  0xee   :  { %v880_v46 = vpop.eup %879  ;;  %837 = vmatprep.mubr.msk.f32.mxu1 %vm54_vm0, %v878_v44  ;;  %889 = vtanh.f32 %v205_v42 }
  0xef   :  { %838 = vmatmul.mubr.msk.f32.vlgmr.msra.gmra.mrb[0].mxu1 %vm54_vm0, %v880_v46  ;;  %891 = vtanh.f32 %v200_v45  ;;  %v819_v47 = vpop.f32.mrb[8].mxu0 }
  0xf0   :  { %v882_v48 = vpop.eup %881  ;;  %v215_v49 = vadd.f32 %v819_v47, %v1136_v28  ;;  %v209_v50 = vpop.f32.mrb[9].mxu0 }
  0xf1   :  { %v884_v51 = vpop.eup %883  ;;  %v210_v52 = vadd.f32 %v1136_v28, %v209_v50 }
  0xf2   :  { %840 = vmatprep.mubr.msk.f32.mxu1 %vm54_vm0, %v884_v51  ;;  %893 = vtanh.f32 %v215_v49 }
  0xf3   :  { %841 = vmatmul.mubr.msk.f32.gmra.mrb[2].mxu1 %vm54_vm0, %v882_v48  ;;  %895 = vtanh.f32 %v210_v52  ;;  %v822_v53 = vpop.f32.mrb[10].mxu0 }
  0xf4   :  { %v886_v54 = vpop.eup %885  ;;  %v225_v55 = vadd.f32 %v822_v53, %v1136_v28  ;;  %v219_v56 = vpop.f32.mrb[11].mxu0 }
  0xf5   :  { %v888_v57 = vpop.eup %887  ;;  %v220_v58 = vadd.f32 %v1136_v28, %v219_v56 }
  0xf6   :  { %843 = vmatprep.mubr.msk.f32.mxu1 %vm54_vm0, %v888_v57  ;;  %897 = vtanh.f32 %v225_v55 }
  0xf7   :  { %844 = vmatmul.mubr.msk.f32.gmra.mrb[4].mxu1 %vm54_vm0, %v886_v54  ;;  %899 = vtanh.f32 %v220_v58  ;;  %v825_v59 = vpop.f32.mrb[12].mxu0 }
  0xf8   :  { %v890_v60 = vpop.eup %889  ;;  %v235_v61 = vadd.f32 %v825_v59, %v1136_v28  ;;  %v229_v62 = vpop.f32.mrb[13].mxu0 }
  0xf9   :  { %v892_v63 = vpop.eup %891  ;;  %v230_v0 = vadd.f32 %v1136_v28, %v229_v62 }
  0xfa   :  { %846 = vmatprep.mubr.msk.f32.mxu1 %vm54_vm0, %v892_v63  ;;  %901 = vtanh.f32 %v235_v61 }
  0xfb   :  { %847 = vmatmul.mubr.msk.f32.gmra.mrb[6].mxu1 %vm54_vm0, %v890_v60  ;;  %903 = vtanh.f32 %v230_v0  ;;  %v828_v1 = vpop.f32.mrb[14].mxu0 }
  0xfc   :  { %v894_v2 = vpop.eup %893  ;;  %v245_v3 = vadd.f32 %v828_v1, %v1136_v28  ;;  %v239_v4 = vpop.f32.mrb[15].mxu0 }
  0xfd   :  { %v896_v5 = vpop.eup %895  ;;  %v240_v6 = vadd.f32 %v1136_v28, %v239_v4 }
  0xfe   :  { %849 = vmatprep.mubr.msk.f32.mxu1 %vm54_vm0, %v896_v5  ;;  %905 = vtanh.f32 %v245_v3 }
  0xff   :  { %850 = vmatmul.mubr.msk.f32.gmra.mrb[8].mxu1 %vm54_vm0, %v894_v2  ;;  %907 = vtanh.f32 %v240_v6 }
 0x100   :  { %v898_v7 = vpop.eup %897 }
 0x101   :  { %v900_v8 = vpop.eup %899 }
 0x102   :  { %852 = vmatprep.mubr.msk.f32.mxu1 %vm54_vm0, %v900_v8 }
 0x103   :  { %853 = vmatmul.mubr.msk.f32.gmra.mrb[10].mxu1 %vm54_vm0, %v898_v7 }
 0x104   :  { %v902_v9 = vpop.eup %901 }
 0x105   :  { %v904_v10 = vpop.eup %903 }
 0x106   :  { %855 = vmatprep.mubr.msk.f32.mxu1 %vm54_vm0, %v904_v10 }
 0x107   :  { %856 = vmatmul.mubr.msk.f32.gmra.mrb[12].mxu1 %vm54_vm0, %v902_v9 }
 0x108   :  { %v906_v11 = vpop.eup %905 }
 0x109   :  { %v908_v12 = vpop.eup %907 }
 0x10a   :  { %858 = vmatprep.mubr.msk.f32.mxu1 %vm54_vm0, %v908_v12 }
 0x10b   :  { %859 = vmatmul.mubr.msk.f32.gmra.mrb[14].mxu1 %vm54_vm0, %v906_v11 }
 0x1c2   :  { %v839_v14 = vpop.f32.mrb[0].mxu1 }
 0x1c3   :  { %v395_v15 = vadd.f32 %v839_v14, %v1173_v13  ;;  %v389_v16 = vpop.f32.mrb[1].mxu1 }
 0x1c4   :  { %v390_v17 = vadd.f32 %v1173_v13, %v389_v16 }
 0x1c5   :  { %909 = vtanh.f32 %v395_v15 }
 0x1c6   :  { %911 = vtanh.f32 %v390_v17  ;;  %v842_v18 = vpop.f32.mrb[2].mxu1 }
 0x1c7   :  { %v405_v19 = vadd.f32 %v842_v18, %v1173_v13  ;;  %v399_v20 = vpop.f32.mrb[3].mxu1 }
 0x1c8   :  { %v400_v21 = vadd.f32 %v1173_v13, %v399_v20 }
 0x1c9   :  { %913 = vtanh.f32 %v405_v19 }
 0x1ca   :  { %915 = vtanh.f32 %v400_v21  ;;  %v845_v22 = vpop.f32.mrb[4].mxu1 }
 0x1cb   :  { %v415_v23 = vadd.f32 %v845_v22, %v1173_v13  ;;  %v409_v24 = vpop.f32.mrb[5].mxu1 }
 0x1cc   :  { %v410_v25 = vadd.f32 %v1173_v13, %v409_v24 }
 0x1cd   :  { %917 = vtanh.f32 %v415_v23 }
 0x1ce   :  { %919 = vtanh.f32 %v410_v25  ;;  %v848_v27 = vpop.f32.mrb[6].mxu1 }
 0x1cf   :  { %v910_v28 = vpop.eup %909  ;;  %v425_v29 = vadd.f32 %v848_v27, %v1173_v13  ;;  %v419_v30 = vpop.f32.mrb[7].mxu1 }
 0x1d0   :  { %v912_v31 = vpop.eup %911  ;;  %v420_v32 = vadd.f32 %v1173_v13, %v419_v30  ;;  %v492_v37 = vmul.f32 %v910_v28, %v1184_v26 }
 0x1d1   :  { %v491_v33 = vmul.f32 %v912_v31, %v1184_v26  ;;  %921 = vtanh.f32 %v425_v29 }
 0x1d2   :  { %923 = vtanh.f32 %v420_v32  ;;  %v851_v34 = vpop.f32.mrb[8].mxu1  ;;  %v510_v46 = vsel %vm54_vm0, %v492_v37, 0.0  ;;  %v1231_v32 = vstv %s1258_s6 }
 0x1d3   :  { %v914_v35 = vpop.eup %913  ;;  %v507_v36 = vsel %vm54_vm0, %v491_v33, 0.0  ;;  %v435_v38 = vadd.f32 %v851_v34, %v1173_v13  ;;  %v429_v39 = vpop.f32.mrb[9].mxu1 }
 0x1d4   :  { %v916_v40 = vpop.eup %915  ;;  %508 = vadd.xlane.f32.xlu0 %v507_v36  ;;  %v430_v41 = vadd.f32 %v1173_v13, %v429_v39  ;;  %v494_v47 = vmul.f32 %v914_v35, %v1184_v26 }
 0x1d5   :  { %v493_v42 = vmul.f32 %v916_v40, %v1184_v26  ;;  %925 = vtanh.f32 %v435_v38 }
 0x1d6   :  { %927 = vtanh.f32 %v430_v41  ;;  %v854_v43 = vpop.f32.mrb[10].mxu1  ;;  %v516_v56 = vsel %vm54_vm0, %v494_v47, 0.0 }
 0x1d7   :  { %v918_v44 = vpop.eup %917  ;;  %v513_v45 = vsel %vm54_vm0, %v493_v42, 0.0  ;;  %v445_v48 = vadd.f32 %v854_v43, %v1173_v13  ;;  %v439_v49 = vpop.f32.mrb[11].mxu1 }
 0x1d8   :  { %v920_v50 = vpop.eup %919  ;;  %514 = vadd.xlane.f32.xlu1 %v513_v45  ;;  %511 = vadd.xlane.f32.xlu0 %v510_v46  ;;  %v440_v51 = vadd.f32 %v1173_v13, %v439_v49  ;;  %v496_v52 = vmul.f32 %v918_v44, %v1184_v26 }
 0x1d9   :  { %v495_v53 = vmul.f32 %v920_v50, %v1184_v26  ;;  %929 = vtanh.f32 %v445_v48 }
 0x1da   :  { %931 = vtanh.f32 %v440_v51  ;;  %v857_v54 = vpop.f32.mrb[12].mxu1  ;;  %v522_v62 = vsel %vm54_vm0, %v496_v52, 0.0 }
 0x1db   :  { %v922_v55 = vpop.eup %921  ;;  %v519_v57 = vsel %vm54_vm0, %v495_v53, 0.0  ;;  %v455_v58 = vadd.f32 %v857_v54, %v1173_v13  ;;  %v449_v59 = vpop.f32.mrb[13].mxu1 }
 0x1dc   :  { %v924_v60 = vpop.eup %923  ;;  %517 = vadd.xlane.f32.xlu1 %v516_v56  ;;  %520 = vadd.xlane.f32.xlu0 %v519_v57  ;;  %v450_v61 = vadd.f32 %v1173_v13, %v449_v59  ;;  %v498_v63 = vmul.f32 %v922_v55, %v1184_v26 }
 0x1dd   :  { %v497_v0 = vmul.f32 %v924_v60, %v1184_v26  ;;  %933 = vtanh.f32 %v455_v58 }
 0x1de   :  { %935 = vtanh.f32 %v450_v61  ;;  %v860_v1 = vpop.f32.mrb[14].mxu1  ;;  %v528_v8 = vsel %vm54_vm0, %v498_v63, 0.0 }
 0x1df   :  { %v926_v2 = vpop.eup %925  ;;  %v525_v3 = vsel %vm54_vm0, %v497_v0, 0.0  ;;  %v465_v4 = vadd.f32 %v860_v1, %v1173_v13  ;;  %v459_v5 = vpop.f32.mrb[15].mxu1 }
 0x1e0   :  { %v928_v6 = vpop.eup %927  ;;  %523 = vadd.xlane.f32.xlu1 %v522_v62  ;;  %526 = vadd.xlane.f32.xlu0 %v525_v3  ;;  %v460_v7 = vadd.f32 %v1173_v13, %v459_v5  ;;  %v500_v9 = vmul.f32 %v926_v2, %v1184_v26 }
 0x1e1   :  { %v499_v10 = vmul.f32 %v928_v6, %v1184_v26  ;;  %937 = vtanh.f32 %v465_v4 }
 0x1e2   :  { %939 = vtanh.f32 %v460_v7  ;;  %v534_v15 = vsel %vm54_vm0, %v500_v9, 0.0 }
 0x1e3   :  { %v930_v11 = vpop.eup %929  ;;  %v531_v12 = vsel %vm54_vm0, %v499_v10, 0.0 }
 0x1e4   :  { %v932_v14 = vpop.eup %931  ;;  %529 = vadd.xlane.f32.xlu1 %v528_v8  ;;  %532 = vadd.xlane.f32.xlu0 %v531_v12  ;;  %v502_v16 = vmul.f32 %v930_v11, %v1184_v26 }
 0x1e5   :  { %v501_v13 = vmul.f32 %v932_v14, %v1184_v26 }
 0x1e6   :  { %v540_v20 = vsel %vm54_vm0, %v502_v16, 0.0 }
 0x1e7   :  { %v934_v17 = vpop.eup %933  ;;  %v537_v18 = vsel %vm54_vm0, %v501_v13, 0.0 }
 0x1e8   :  { %v936_v19 = vpop.eup %935  ;;  %535 = vadd.xlane.f32.xlu1 %v534_v15  ;;  %538 = vadd.xlane.f32.xlu0 %v537_v18  ;;  %v504_v21 = vmul.f32 %v934_v17, %v1184_v26 }
 0x1e9   :  { %v503_v22 = vmul.f32 %v936_v19, %v1184_v26 }
 0x1ea   :  { %v546_v27 = vsel %vm54_vm0, %v504_v21, 0.0 }
 0x1eb   :  { %v938_v23 = vpop.eup %937  ;;  %v543_v24 = vsel %vm54_vm0, %v503_v22, 0.0 }
 0x1ec   :  { %v940_v25 = vpop.eup %939  ;;  %541 = vadd.xlane.f32.xlu1 %v540_v20  ;;  %544 = vadd.xlane.f32.xlu0 %v543_v24  ;;  %v506_v28 = vmul.f32 %v938_v23, %v1184_v26 }
 0x1ed   :  { %v505_v29 = vmul.f32 %v940_v25, %v1184_v26 }
 0x1ee   :  { %v552_v31 = vsel %vm54_vm0, %v506_v28, 0.0 }
 0x1ef   :  { %v549_v30 = vsel %vm54_vm0, %v505_v29, 0.0 }
 0x1f0   :  { %547 = vadd.xlane.f32.xlu1 %v546_v27  ;;  %550 = vadd.xlane.f32.xlu0 %v549_v30 }
 0x1f4   :  { %553 = vadd.xlane.f32.xlu1 %v552_v31 }
 0x261   :  { %v509_v33 = vpop.xlane.xlu0 %508 }
 0x262   :  { %v557_v34 = vadd.f32 %v1231_v32, %v509_v33 }
 0x264   :  { %v741_v35 = vmul.f32 -1.442695, %v557_v34 }
 0x265   :  { %v515_v36 = vpop.xlane.xlu1 %514  ;;  %v512_v37 = vpop.xlane.xlu0 %511 }
 0x266   :  { %941 = vpow2.f32 %v741_v35  ;;  %v559_v26 = vadd.f32 %v1231_v32, %v515_v36  ;;  %v558_v38 = vadd.f32 %v1231_v32, %v512_v37 }
 0x268   :  { %v743_v39 = vmul.f32 -1.442695, %v559_v26  ;;  %v742_v40 = vmul.f32 -1.442695, %v558_v38 }
 0x269   :  { %v518_v41 = vpop.xlane.xlu1 %517  ;;  %v521_v42 = vpop.xlane.xlu0 %520 }
 0x26a   :  { %943 = vpow2.f32 %v743_v39  ;;  %v560_v43 = vadd.f32 %v1231_v32, %v518_v41  ;;  %v561_v44 = vadd.f32 %v1231_v32, %v521_v42 }
 0x26b   :  { %945 = vpow2.f32 %v742_v40 }
 0x26c   :  { %v744_v45 = vmul.f32 -1.442695, %v560_v43  ;;  %v745_v47 = vmul.f32 -1.442695, %v561_v44 }
 0x26d   :  { %v524_v46 = vpop.xlane.xlu1 %523  ;;  %v527_v50 = vpop.xlane.xlu0 %526 }
 0x26e   :  { %947 = vpow2.f32 %v744_v45  ;;  %v562_v48 = vadd.f32 %v1231_v32, %v524_v46  ;;  %v563_v53 = vadd.f32 %v1231_v32, %v527_v50 }
 0x26f   :  { %949 = vpow2.f32 %v745_v47 }
 0x270   :  { %v942_v49 = vpop.eup %941  ;;  %v746_v52 = vmul.f32 -1.442695, %v562_v48  ;;  %v747_v59 = vmul.f32 -1.442695, %v563_v53 }
 0x271   :  { %v621_v51 = vadd.f32 1.0, %v942_v49  ;;  %v530_v55 = vpop.xlane.xlu1 %529  ;;  %v533_v61 = vpop.xlane.xlu0 %532 }
 0x272   :  { %v564_v58 = vadd.f32 %v1231_v32, %v530_v55  ;;  %v565_v0 = vadd.f32 %v1231_v32, %v533_v61 }
 0x273   :  { %951 = vrcp.f32 %v621_v51 }
 0x274   :  { %v944_v54 = vpop.eup %943  ;;  %953 = vpow2.f32 %v746_v52  ;;  %v748_v63 = vmul.f32 -1.442695, %v564_v58  ;;  %v749_v6 = vmul.f32 -1.442695, %v565_v0 }
 0x275   :  { %v946_v56 = vpop.eup %945  ;;  %v623_v60 = vadd.f32 1.0, %v944_v54  ;;  %v536_v3 = vpop.xlane.xlu1 %535 }
 0x276   :  { %v622_v57 = vadd.f32 1.0, %v946_v56  ;;  %v566_v5 = vadd.f32 %v1231_v32, %v536_v3  ;;  %v539_v8 = vpop.xlane.xlu0 %538 }
 0x277   :  { %v567_v12 = vadd.f32 %v1231_v32, %v539_v8 }
 0x278   :  { %955 = vrcp.f32 %v622_v57  ;;  %v948_v62 = vpop.eup %947  ;;  %v750_v11 = vmul.f32 -1.442695, %v566_v5 }
 0x279   :  { %957 = vpow2.f32 %v747_v59  ;;  %v950_v1 = vpop.eup %949  ;;  %v624_v2 = vadd.f32 1.0, %v948_v62  ;;  %v542_v15 = vpop.xlane.xlu1 %541  ;;  %v751_v18 = vmul.f32 -1.442695, %v567_v12 }
 0x27a   :  { %959 = vrcp.f32 %v623_v60  ;;  %v625_v7 = vadd.f32 1.0, %v950_v1  ;;  %v568_v17 = vadd.f32 %v1231_v32, %v542_v15  ;;  %v545_v20 = vpop.xlane.xlu0 %544 }
 0x27b   :  { %961 = vpow2.f32 %v748_v63  ;;  %v569_v24 = vadd.f32 %v1231_v32, %v545_v20 }
 0x27c   :  { %963 = vrcp.f32 %v624_v2  ;;  %v752_v23 = vmul.f32 -1.442695, %v568_v17 }
 0x27d   :  { %v952_v4 = vpop.eup %951  ;;  %965 = vpow2.f32 %v749_v6  ;;  %v548_v27 = vpop.xlane.xlu1 %547  ;;  %v753_v31 = vmul.f32 -1.442695, %v569_v24 }
 0x27e   :  { %669 = vxpose.xlu0.b32.start [1/16] (narrow) %v952_v4, 8  ;;  %v954_v9 = vpop.eup %953  ;;  %967 = vrcp.f32 %v625_v7  ;;  %v570_v30 = vadd.f32 %v1231_v32, %v548_v27  ;;  %v551_v34 = vpop.xlane.xlu0 %550 }
 0x27f   :  { %v626_v14 = vadd.f32 1.0, %v954_v9  ;;  %969 = vpow2.f32 %v750_v11  ;;  %v571_v26 = vadd.f32 %v1231_v32, %v551_v34 }
 0x280   :  { %v754_v37 = vmul.f32 -1.442695, %v570_v30 }
 0x281   :  { %971 = vrcp.f32 %v626_v14  ;;  %v554_v39 = vpop.xlane.xlu1 %553  ;;  %v755_v43 = vmul.f32 -1.442695, %v571_v26 }
 0x282   :  { %v956_v10 = vpop.eup %955  ;;  %973 = vpow2.f32 %v751_v18  ;;  %v572_v42 = vadd.f32 %v1231_v32, %v554_v39 }
 0x283   :  { %670 = vxpose.xlu0.b32.cont [2/16] (narrow) %v956_v10, 8  ;;  %v958_v16 = vpop.eup %957 }
 0x284   :  { %v960_v13 = vpop.eup %959  ;;  %v627_v19 = vadd.f32 1.0, %v958_v16  ;;  %v756_v47 = vmul.f32 -1.442695, %v572_v42 }
 0x285   :  { %v962_v21 = vpop.eup %961 }
 0x286   :  { %v964_v22 = vpop.eup %963  ;;  %v628_v25 = vadd.f32 1.0, %v962_v21  ;;  %975 = vrcp.f32 %v627_v19 }
 0x287   :  { %671 = vxpose.xlu0.b32.cont [3/16] (narrow) %v960_v13, 8  ;;  %v966_v28 = vpop.eup %965  ;;  %977 = vpow2.f32 %v752_v23 }
 0x288   :  { %v968_v29 = vpop.eup %967  ;;  %979 = vrcp.f32 %v628_v25  ;;  %v629_v33 = vadd.f32 1.0, %v966_v28 }
 0x289   :  { %v970_v35 = vpop.eup %969  ;;  %981 = vpow2.f32 %v753_v31 }
 0x28a   :  { %v630_v38 = vadd.f32 1.0, %v970_v35  ;;  %983 = vrcp.f32 %v629_v33 }
 0x28b   :  { %672 = vxpose.xlu0.b32.cont [4/16] (narrow) %v964_v22, 8  ;;  %v972_v36 = vpop.eup %971  ;;  %985 = vpow2.f32 %v754_v37 }
 0x28c   :  { %v974_v40 = vpop.eup %973  ;;  %987 = vrcp.f32 %v630_v38 }
 0x28d   :  { %v631_v44 = vadd.f32 1.0, %v974_v40  ;;  %989 = vpow2.f32 %v755_v43 }
 0x28f   :  { %673 = vxpose.xlu0.b32.cont [5/16] (narrow) %v968_v29, 8  ;;  %991 = vrcp.f32 %v631_v44 }
 0x290   :  { %v976_v41 = vpop.eup %975  ;;  %993 = vpow2.f32 %v756_v47 }
 0x291   :  { %v978_v45 = vpop.eup %977 }
 0x292   :  { %v980_v46 = vpop.eup %979  ;;  %v632_v48 = vadd.f32 1.0, %v978_v45 }
 0x293   :  { %674 = vxpose.xlu0.b32.cont [6/16] (narrow) %v972_v36, 8  ;;  %v982_v49 = vpop.eup %981 }
 0x294   :  { %v984_v50 = vpop.eup %983  ;;  %995 = vrcp.f32 %v632_v48  ;;  %v633_v51 = vadd.f32 1.0, %v982_v49 }
 0x295   :  { %v986_v52 = vpop.eup %985 }
 0x296   :  { %v988_v53 = vpop.eup %987  ;;  %v634_v32 = vadd.f32 1.0, %v986_v52  ;;  %997 = vrcp.f32 %v633_v51 }
 0x297   :  { %675 = vxpose.xlu0.b32.cont [7/16] (narrow) %v976_v41, 8  ;;  %v990_v54 = vpop.eup %989 }
 0x298   :  { %999 = vrcp.f32 %v634_v32  ;;  %v635_v56 = vadd.f32 1.0, %v990_v54 }
 0x299   :  { %v992_v55 = vpop.eup %991 }
 0x29a   :  { %v994_v57 = vpop.eup %993  ;;  %1001 = vrcp.f32 %v635_v56 }
 0x29b   :  { %676 = vxpose.xlu0.b32.cont [8/16] (narrow) %v980_v46, 8  ;;  %v636_v59 = vadd.f32 1.0, %v994_v57 }
 0x29d   :  { %1003 = vrcp.f32 %v636_v59 }
 0x29e   :  { %v996_v58 = vpop.eup %995 }
 0x29f   :  { %677 = vxpose.xlu0.b32.cont [9/16] (narrow) %v984_v50, 8 }
 0x2a0   :  { %v998_v60 = vpop.eup %997 }
 0x2a2   :  { %v1000_v61 = vpop.eup %999 }
 0x2a3   :  { %678 = vxpose.xlu0.b32.cont [10/16] (narrow) %v988_v53, 8 }
 0x2a4   :  { %v1002_v62 = vpop.eup %1001 }
 0x2a7   :  { %679 = vxpose.xlu0.b32.cont [11/16] (narrow) %v992_v55, 8  ;;  %v1004_v63 = vpop.eup %1003 }
 0x2ab   :  { %680 = vxpose.xlu0.b32.cont [12/16] (narrow) %v996_v58, 8 }
 0x2af   :  { %681 = vxpose.xlu0.b32.cont [13/16] (narrow) %v998_v60, 8 }
 0x2b3   :  { %682 = vxpose.xlu0.b32.cont [14/16] (narrow) %v1000_v61, 8 }
 0x2b7   :  { %683 = vxpose.xlu0.b32.cont [15/16] (narrow) %v1002_v62, 8 }
 0x2bb   :  { %684 = vxpose.xlu0.b32.end [16/16] (narrow) %v1004_v63, 8 }
 0x2ff   :  { %v685_v0 = vpop.trf.xlu0 }
 0x300   :  { %701 = vst [vmem:[%s1259_s7] sm:$0x1] %v685_v0 }

</bundles_post_ra>
